<compile_context>
chip_gen: v5e
topology: v5e:2x2
jax: 0.10.0
libtpu: 0.0.40
codegen_flags: <defaults>
</compile_context>

<pallas_src>
import jax
import jax.numpy as jnp
from jax.experimental import pallas as pl
from jax.experimental.pallas import tpu as pltpu


def _copy_kernel(x_ref, o_ref):
    # Identity copy of the current tile (the value stream is unchanged by squeeze).
    o_ref[...] = x_ref[...]


# ~4 MiB per block: with in + out each double-buffered (4 live buffers ~= 16 MiB)
# this fits the scoped-VMEM budget on v5e, v6e and v7x with comfortable headroom.
_TARGET_BLOCK_BYTES = 4 * 1024 * 1024


def _lane_width(total: int) -> int:
    """Largest multiple of 128 (<= 4096) that divides `total`; 0 if none."""
    for cand in (4096, 2048, 1024, 512, 256, 128):
        if total % cand == 0:
            return cand
    return 0


def _pick_tile_rows(rows: int, lanes: int, itemsize: int) -> int:
    """Row-tile: multiple of 8 sublanes, ~4 MiB, preferring an exact divisor of
    `rows` so every grid step issues full unmasked stores; falls back to a capped
    tile (Pallas masks the ragged last block correctly)."""
    if rows <= 8:
        return rows  # full extent (always legal)
    target = max(8, (_TARGET_BLOCK_BYTES // (lanes * itemsize)) // 8 * 8)
    if rows <= target:
        return rows  # whole array in one block
    # Prefer the largest divisor of `rows` that is a multiple of 8 and <= target.
    best = 0
    cand = target
    while cand >= 8:
        if rows % cand == 0:
            best = cand
            break
        cand -= 8
    return best if best else target


def squeeze_pallas(x: jax.Array) -> jax.Array:
    """Equivalent of torch.squeeze(x): drops every size-1 axis."""
    out_shape = tuple(d for d in x.shape if d != 1)
    total = 1
    for d in x.shape:
        total *= d

    # NOTE: the cheapest correct implementation is `jnp.reshape(x, out_shape)` alone
    # (zero data movement). The Pallas identity copy is kept because a kernel is
    # mandated; it is structured to cost as little as possible.

    if len(out_shape) == 0:
        # Degenerate all-size-1 input -> scalar. Tiny (1, 1) tile, single step.
        x2d = jnp.reshape(x, (1, 1))
        out2d = pl.pallas_call(
            _copy_kernel,
            out_shape=jax.ShapeDtypeStruct((1, 1), x.dtype),
            in_specs=[pl.BlockSpec((1, 1), lambda: (0, 0))],
            out_specs=pl.BlockSpec((1, 1), lambda: (0, 0)),
            input_output_aliases={0: 0},
        )(x2d)
        return jnp.reshape(out2d, out_shape)

    lanes = _lane_width(total)

    if lanes == 0:
        # Element count not a multiple of 128: small/odd case. A full-extent
        # (1, total) block is legal (block == full dims) and the data is tiny
        # by construction.
        x2d = jnp.reshape(x, (1, total))
        out2d = pl.pallas_call(
            _copy_kernel,
            out_shape=jax.ShapeDtypeStruct((1, total), x.dtype),
            in_specs=[pl.BlockSpec((1, total), lambda: (0, 0))],
            out_specs=pl.BlockSpec((1, total), lambda: (0, 0)),
            input_output_aliases={0: 0},
        )(x2d)
        return jnp.reshape(out2d, out_shape)

    # Lane-dense 2D view: last dim a multiple of 128 -> unmasked vst, no wasted lanes.
    itemsize = jnp.dtype(x.dtype).itemsize
    rows = total // lanes
    x2d = jnp.reshape(x, (rows, lanes))  # metadata-only row-major flatten

    tile_rows = _pick_tile_rows(rows, lanes, itemsize)
    grid = (pl.cdiv(rows, tile_rows),)

    out2d = pl.pallas_call(
        _copy_kernel,
        out_shape=jax.ShapeDtypeStruct((rows, lanes), x.dtype),
        grid=grid,
        in_specs=[pl.BlockSpec((tile_rows, lanes), lambda i: (i, 0))],
        out_specs=pl.BlockSpec((tile_rows, lanes), lambda i: (i, 0)),
        # Output aliases the input buffer: lets XLA elide the HBM round-trip entirely
        # when the producer buffer is donatable; otherwise a plain pipelined copy.
        input_output_aliases={0: 0},
        compiler_params=pltpu.CompilerParams(
            # "parallel" shards the row-tile axis across v7x's 2 TensorCores
            # (harmless no-op on single-TC v5e/v6e).
            dimension_semantics=("parallel",),
            vmem_limit_bytes=64 * 1024 * 1024,
        ),
    )(x2d)
    return jnp.reshape(out2d, out_shape)


if __name__ == "__main__":
    key = jax.random.PRNGKey(0)
    # Rank-4 F32 input with a unit dim so squeeze actually changes rank:
    # (2, 1, 16, 16) -> squeeze -> (2, 16, 16)
    x = jax.random.normal(key, (2, 1, 16, 16), dtype=jnp.float32)

    y = squeeze_pallas(x)
    jax.block_until_ready(y)

    expected = jnp.squeeze(x)
    assert y.shape == expected.shape, (y.shape, expected.shape)
    assert y.dtype == x.dtype
    assert bool(jnp.allclose(y, expected)), "value mismatch vs jnp.squeeze"

    print("KERNEL_OK")
</pallas_src>

<mosaic_0001>
module attributes {stable_mosaic.version = 11 : i64} {
  func.func @_copy_kernel(%arg0: i32, %arg1: memref<1x512xf32, #tpu.memory_space<vmem>>, %arg2: memref<1x512xf32, #tpu.memory_space<vmem>>) attributes {dimension_semantics = [#tpu.dimension_semantics<parallel>], iteration_bounds = array<i64: 1>, scalar_prefetch = 0 : i64, scratch_operands = 0 : i64, tpu.core_type = #tpu.core_type<tc>, window_params = [{transform_indices = @transform_0, window_bounds = array<i64: 1, 512>}, {transform_indices = @transform_1, window_bounds = array<i64: 1, 512>}]} {
    %c0 = arith.constant 0 : index
    %c0_0 = arith.constant 0 : index
    %0 = vector.load %arg1[%c0, %c0_0] : memref<1x512xf32, #tpu.memory_space<vmem>>, vector<1x512xf32>
    %c0_1 = arith.constant 0 : index
    %c0_2 = arith.constant 0 : index
    %1 = vector.load %arg2[%c0_1, %c0_2] : memref<1x512xf32, #tpu.memory_space<vmem>>, vector<1x512xf32>
    tpu.vector_store %arg2[%c0_1, %c0_2], %0 {strides = array<i32>} : memref<1x512xf32, #tpu.memory_space<vmem>>, vector<1x512xf32>,
    return
  }
  func.func @transform_0(%arg0: i32) -> (i32, i32) {
    %c0_i32 = arith.constant 0 : i32
    %c0_i32_0 = arith.constant 0 : i32
    return %arg0, %c0_i32 : i32, i32
  }
  func.func @transform_1(%arg0: i32) -> (i32, i32) {
    %c0_i32 = arith.constant 0 : i32
    %c0_i32_0 = arith.constant 0 : i32
    return %arg0, %c0_i32 : i32, i32
  }
}

</mosaic_0001>

<bundles_post_ra>
// kernel: tpu_custom_call.1
= control target key start
LH: loop header
LB: loop body
LE: loop exit
PB: predicated region body
PF: predicated region fallthrough
CT: control target
= control target key end

     0   :  { %6 = vsyncpa [#allocation3], 0  ;;  %s118_s0 = inlined_call_operand.hbm [shape: f32[1,512], index: 0, kind: input, shape index: {}, may-alias: {0,1}]   ;;  %s119_s1 = inlined_call_operand.hbm [shape: f32[1,512], index: 1, kind: output, shape index: {}, may-alias: {0,1}]  }
   0x1   :  { %7 = vsyncpa [#allocation4], 0  ;;  %s13_s8 = sshll.u32 %s118_s0, 4  ;;  %s100_s9 = smov [#allocation2]   ;;  %s14_s8 = int_to_ptr.hbm [resolvable:$true] %s13_s8 }
   0x2   :  { %s15_s10 = sshll.u32 %s100_s9, 4  ;;  %s16_s10 = int_to_ptr.vmem [resolvable:$true] %s15_s10 }
   0x3   :  { %18 = dma.hbm_to_vmem [thread:$0]  %s14_s8, 64, %s16_s10, [#allocation3]  }
   0x4   :  { %96 = dma.done.wait [#allocation3], 64  }
   0x5   :  { %97 = vsyncadd [#allocation3], 4294967232  ;;  %v24_v0 = vlaneseq  ;;  %s101_s11 = smov [#allocation5]   ;;  %s36_s15 = sshll.u32 %s119_s1, 4  ;;  %v23_v1 = vld [vmem:[#allocation2] sm:$0xf]  ;;  %s37_s15 = int_to_ptr.hbm [resolvable:$true] %s36_s15 }
   0x6   :  { %s34_s12 = sshll.u32 %s101_s11, 4  ;;  %s35_s12 = int_to_ptr.vmem [resolvable:$true] %s34_s12 }
   0x7   :  { %vm26_vm0 = vcmp.lt.s32.totalorder %v24_v0, 512 }
   0x8   :  { %28 = vst.msk [vmem:[#allocation5] sm:$0xf] %vm26_vm0, %v23_v1 }
   0x9   :  { %39 = dma.vmem_to_hbm [thread:$0]  %s35_s12, 64, %s37_s15, [#allocation4]  }
   0xa   :  { %98 = dma.done.wait [#allocation4], 64  }
   0xb   :  { %99 = vsyncadd [#allocation4], 4294967232 }
   0xc   :  { %44 = vsyncpa [#allocation3], 1 }
   0xd   :  { %45 = vsyncpa [#allocation4], 1 }

</bundles_post_ra>
